<compile_context>
chip_gen: v7x
topology: tpu7x:2x2x1
jax: 0.10.0
libtpu: 0.0.40
codegen_flags: <defaults>
</compile_context>

<pallas_src>
import jax
import jax.numpy as jnp
from jax.experimental import pallas as pl
from jax.experimental.pallas import tpu as pltpu


EMBED_DIM = 50        # logical embedding dim (matches the PyTorch module)
EMBED_PAD = 64        # padded embedding dim (sublane/MXU friendly)
H1 = 128
H2 = 64


def _round_up(x, m):
    return ((x + m - 1) // m) * m


def _choose_tile_b(b, tile_b):
    """Pick the batch tile: multiple of 128 (lane-dense output), capped at tile_b,
    and split into >= 2 grid steps when there is enough work (v7x has 2 TCs)."""
    b_lane = _round_up(b, 128)
    tb = min(tile_b, b_lane)
    if b_lane // tb < 2 and b_lane >= 2 * 1024:
        tb = _round_up(b_lane // 2, 128)
    return tb


def ncf_mlp_kernel(u_ref, it_ref, w1u_ref, w1i_ref, b1_ref,
                   w2_ref, b2_ref, w3t_ref, b3_ref, o_ref):
    """Fused MLP tile: sigmoid(relu(relu([u|it]@W1+b1)@W2+b2)@W3+b3)."""
    # Layer 1: split-W1 bf16 matmuls with f32 accumulation (== concat @ W1).
    h1 = (jnp.dot(u_ref[...], w1u_ref[...], preferred_element_type=jnp.float32)
          + jnp.dot(it_ref[...], w1i_ref[...], preferred_element_type=jnp.float32)
          + b1_ref[...])
    h1 = jnp.maximum(h1, 0.0)

    # Layer 2: bf16 operands into the MXU, f32 accumulate, f32 bias/ReLU.
    h2 = jnp.dot(h1.astype(jnp.bfloat16), w2_ref[...],
                 preferred_element_type=jnp.float32) + b2_ref[...]
    h2 = jnp.maximum(h2, 0.0)

    # Layer 3 (64 -> 1), lane-dense: contract the feature dim so the batch
    # lands on the lane axis: (1, 64) x (TB, 64)^T -> (1, TB).
    logits = jax.lax.dot_general(
        w3t_ref[...], h2.astype(jnp.bfloat16),
        dimension_numbers=(((1,), (1,)), ((), ())),
        preferred_element_type=jnp.float32)
    logits = logits + b3_ref[0, 0]                    # scalar bias from SMEM
    o_ref[...] = jax.nn.sigmoid(logits)[None, :, :]   # (1, 1, TB) dense store


def ncf_forward(params, user_ids, item_ids, *, tile_b=8192):
    """Full NCF forward. Embedding gather is XLA glue; the MLP is one Pallas call."""
    b = user_ids.shape[0]
    tb = _choose_tile_b(b, tile_b)
    b_pad = _round_up(b, tb)
    if b_pad != b:
        pad = b_pad - b
        user_ids = jnp.pad(user_ids, (0, pad))   # padded rows gather row 0, sliced off below
        item_ids = jnp.pad(item_ids, (0, pad))

    # TODO(synk): fuse this gather into the kernel (scalar-prefetched ids).
    user_emb = jnp.take(params["user_embedding"], user_ids, axis=0)   # (B_pad, 64) bf16
    item_emb = jnp.take(params["item_embedding"], item_ids, axis=0)   # (B_pad, 64) bf16

    n_tiles = b_pad // tb

    out = pl.pallas_call(
        ncf_mlp_kernel,
        out_shape=jax.ShapeDtypeStruct((n_tiles, 1, tb), jnp.float32),
        grid=(n_tiles,),
        in_specs=[
            pl.BlockSpec((tb, EMBED_PAD), lambda i: (i, 0)),     # user emb tile
            pl.BlockSpec((tb, EMBED_PAD), lambda i: (i, 0)),     # item emb tile
            pl.BlockSpec((EMBED_PAD, H1), lambda i: (0, 0)),     # W1_user (resident)
            pl.BlockSpec((EMBED_PAD, H1), lambda i: (0, 0)),     # W1_item (resident)
            pl.BlockSpec((1, H1), lambda i: (0, 0)),             # b1
            pl.BlockSpec((H1, H2), lambda i: (0, 0)),            # W2
            pl.BlockSpec((1, H2), lambda i: (0, 0)),             # b2
            pl.BlockSpec((1, H2), lambda i: (0, 0)),             # W3^T (1, 64)
            pl.BlockSpec(memory_space=pltpu.MemorySpace.SMEM),   # b3 scalar
        ],
        out_specs=pl.BlockSpec((1, 1, tb), lambda i: (i, 0, 0)),
        compiler_params=pltpu.CompilerParams(
            dimension_semantics=("parallel",),
            # ~16 MiB needed at TB=8192 (2 bf16 input tiles x 2 bufs + f32
            # h1/h2 temporaries + resident weights); 48 MiB leaves headroom
            # everywhere and stays under v7x's 64 MiB physical VMEM.
            vmem_limit_bytes=48 * 1024 * 1024,
        ),
    )(
        user_emb, item_emb,
        params["w1_user"], params["w1_item"], params["b1"],
        params["w2"], params["b2"],
        params["w3_t"], params["b3"],
    )

    # matches output.squeeze() of the PyTorch module
    return out.reshape(b_pad)[:b]


def init_params(key, num_users, num_items, embedding_dim=EMBED_DIM):
    """Init mirroring nn.Embedding (N(0,1)) and nn.Linear (U(+-1/sqrt(fan_in)))."""
    ks = jax.random.split(key, 8)

    user_embedding = jax.random.normal(ks[0], (num_users, embedding_dim), jnp.float32)
    item_embedding = jax.random.normal(ks[1], (num_items, embedding_dim), jnp.float32)

    def linear(kw, kb, fan_in, fan_out):
        bound = 1.0 / (fan_in ** 0.5)
        w = jax.random.uniform(kw, (fan_in, fan_out), jnp.float32, -bound, bound)
        bias = jax.random.uniform(kb, (1, fan_out), jnp.float32, -bound, bound)
        return w, bias

    w1, b1 = linear(ks[2], ks[3], 2 * embedding_dim, H1)   # (100, 128)
    w2, b2 = linear(ks[4], ks[5], H1, H2)                  # (128, 64)
    w3, b3 = linear(ks[6], ks[7], H2, 1)                   # (64, 1)

    pad_e = EMBED_PAD - embedding_dim

    def pad_cols(x):   # (N, 50) -> (N, 64), zero cols
        return jnp.pad(x, ((0, 0), (0, pad_e)))

    def pad_rows(x):   # (50, 128) -> (64, 128), zero rows
        return jnp.pad(x, ((0, pad_e), (0, 0)))

    return {
        # embeddings + matmul weights stored bf16 (halves dominant HBM bytes);
        # padded cols/rows are zero so the math is identical to the 50-dim model.
        "user_embedding": pad_cols(user_embedding).astype(jnp.bfloat16),   # (U, 64)
        "item_embedding": pad_cols(item_embedding).astype(jnp.bfloat16),   # (I, 64)
        "w1_user": pad_rows(w1[:embedding_dim]).astype(jnp.bfloat16),      # (64, 128)
        "w1_item": pad_rows(w1[embedding_dim:]).astype(jnp.bfloat16),      # (64, 128)
        "b1": b1,                                                          # (1, 128) f32
        "w2": w2.astype(jnp.bfloat16),                                     # (128, 64)
        "b2": b2,                                                          # (1, 64) f32
        "w3_t": w3.T.astype(jnp.bfloat16),                                 # (1, 64) bf16
        "b3": b3,                                                          # (1, 1) f32 (SMEM)
    }


def reference_forward(params, user_ids, item_ids):
    """Pure-JAX f32 reference (same stored params) for the correctness check."""
    u = jnp.take(params["user_embedding"], user_ids, axis=0).astype(jnp.float32)
    it = jnp.take(params["item_embedding"], item_ids, axis=0).astype(jnp.float32)
    h1 = jnp.maximum(
        u @ params["w1_user"].astype(jnp.float32)
        + it @ params["w1_item"].astype(jnp.float32)
        + params["b1"], 0.0)
    h2 = jnp.maximum(h1 @ params["w2"].astype(jnp.float32) + params["b2"], 0.0)
    logits = jnp.sum(h2 * params["w3_t"].astype(jnp.float32),
                     axis=-1, keepdims=True) + params["b3"]
    return jax.nn.sigmoid(logits)[:, 0]


if __name__ == "__main__":
    key = jax.random.PRNGKey(0)
    k_params, k_users, k_items = jax.random.split(key, 3)

    num_users, num_items, batch = 32, 48, 8
    params = init_params(k_params, num_users, num_items)

    user_ids = jax.random.randint(k_users, (batch,), 0, num_users, dtype=jnp.int32)
    item_ids = jax.random.randint(k_items, (batch,), 0, num_items, dtype=jnp.int32)

    out = jax.block_until_ready(ncf_forward(params, user_ids, item_ids))
    ref = jax.block_until_ready(reference_forward(params, user_ids, item_ids))

    assert out.shape == (batch,)
    # bf16 matmul operands -> loosened tolerance vs the f32 reference.
    assert jnp.allclose(out, ref, atol=2e-2, rtol=2e-2), (out, ref)

    print("KERNEL_OK")
</pallas_src>

<mosaic_0001>
module attributes {stable_mosaic.version = 11 : i64} {
  func.func @ncf_mlp_kernel(%arg0: i32, %arg1: memref<128x64xbf16, #tpu.memory_space<vmem>>, %arg2: memref<128x64xbf16, #tpu.memory_space<vmem>>, %arg3: memref<64x128xbf16, #tpu.memory_space<vmem>>, %arg4: memref<64x128xbf16, #tpu.memory_space<vmem>>, %arg5: memref<1x128xf32, #tpu.memory_space<vmem>>, %arg6: memref<128x64xbf16, #tpu.memory_space<vmem>>, %arg7: memref<1x64xf32, #tpu.memory_space<vmem>>, %arg8: memref<1x64xbf16, #tpu.memory_space<vmem>>, %arg9: memref<1x1xf32, #tpu.memory_space<smem>>, %arg10: memref<1x1x128xf32, #tpu.memory_space<vmem>>) attributes {dimension_semantics = [#tpu.dimension_semantics<parallel>], iteration_bounds = array<i64: 1>, scalar_prefetch = 0 : i64, scratch_operands = 0 : i64, tpu.core_type = #tpu.core_type<tc>, window_params = [{transform_indices = @transform_0, window_bounds = array<i64: 128, 64>}, {transform_indices = @transform_1, window_bounds = array<i64: 128, 64>}, {pipeline_mode = #tpu.pipeline_mode<synchronous>, transform_indices = @transform_2, window_bounds = array<i64: 64, 128>}, {pipeline_mode = #tpu.pipeline_mode<synchronous>, transform_indices = @transform_3, window_bounds = array<i64: 64, 128>}, {pipeline_mode = #tpu.pipeline_mode<synchronous>, transform_indices = @transform_4, window_bounds = array<i64: 1, 128>}, {pipeline_mode = #tpu.pipeline_mode<synchronous>, transform_indices = @transform_5, window_bounds = array<i64: 128, 64>}, {pipeline_mode = #tpu.pipeline_mode<synchronous>, transform_indices = @transform_6, window_bounds = array<i64: 1, 64>}, {pipeline_mode = #tpu.pipeline_mode<synchronous>, transform_indices = @transform_7, window_bounds = array<i64: 1, 64>}, {transform_indices = @transform_8, window_bounds = array<i64: 1, 1>}, {transform_indices = @transform_9, window_bounds = array<i64: 1, 1, 128>}]} {
    %c0 = arith.constant 0 : index
    %c0_0 = arith.constant 0 : index
    %0 = vector.load %arg1[%c0, %c0_0] : memref<128x64xbf16, #tpu.memory_space<vmem>>, vector<128x64xbf16>
    %c0_1 = arith.constant 0 : index
    %c0_2 = arith.constant 0 : index
    %1 = vector.load %arg3[%c0_1, %c0_2] : memref<64x128xbf16, #tpu.memory_space<vmem>>, vector<64x128xbf16>
    %cst = arith.constant dense<0.000000e+00> : vector<128x128xf32>
    %2 = tpu.matmul %0, %1, %cst {dimension_numbers = #tpu.dot_dimension_numbers<[1], [0], [0], [1], [0, 0, 1, 1], [], []>} : vector<128x64xbf16>, vector<64x128xbf16>, vector<128x128xf32> -> vector<128x128xf32>
    %c0_3 = arith.constant 0 : index
    %c0_4 = arith.constant 0 : index
    %3 = vector.load %arg2[%c0_3, %c0_4] : memref<128x64xbf16, #tpu.memory_space<vmem>>, vector<128x64xbf16>
    %c0_5 = arith.constant 0 : index
    %c0_6 = arith.constant 0 : index
    %4 = vector.load %arg4[%c0_5, %c0_6] : memref<64x128xbf16, #tpu.memory_space<vmem>>, vector<64x128xbf16>
    %cst_7 = arith.constant dense<0.000000e+00> : vector<128x128xf32>
    %5 = tpu.matmul %3, %4, %cst_7 {dimension_numbers = #tpu.dot_dimension_numbers<[1], [0], [0], [1], [0, 0, 1, 1], [], []>} : vector<128x64xbf16>, vector<64x128xbf16>, vector<128x128xf32> -> vector<128x128xf32>
    %6 = arith.addf %2, %5 : vector<128x128xf32>
    %c0_8 = arith.constant 0 : index
    %c0_9 = arith.constant 0 : index
    %7 = vector.load %arg5[%c0_8, %c0_9] : memref<1x128xf32, #tpu.memory_space<vmem>>, vector<1x128xf32>
    %8 = vector.broadcast %7 : vector<1x128xf32> to vector<128x128xf32>
    %9 = arith.addf %6, %8 : vector<128x128xf32>
    %cst_10 = arith.constant 0.000000e+00 : f32
    %10 = vector.broadcast %cst_10 : f32 to vector<128x128xf32>
    %11 = arith.maximumf %9, %10 : vector<128x128xf32>
    %12 = arith.truncf %11 : vector<128x128xf32> to vector<128x128xbf16>
    %c0_11 = arith.constant 0 : index
    %c0_12 = arith.constant 0 : index
    %13 = vector.load %arg6[%c0_11, %c0_12] : memref<128x64xbf16, #tpu.memory_space<vmem>>, vector<128x64xbf16>
    %cst_13 = arith.constant dense<0.000000e+00> : vector<128x64xf32>
    %14 = tpu.matmul %12, %13, %cst_13 {dimension_numbers = #tpu.dot_dimension_numbers<[1], [0], [0], [1], [0, 0, 1, 1], [], []>} : vector<128x128xbf16>, vector<128x64xbf16>, vector<128x64xf32> -> vector<128x64xf32>
    %c0_14 = arith.constant 0 : index
    %c0_15 = arith.constant 0 : index
    %15 = vector.load %arg7[%c0_14, %c0_15] : memref<1x64xf32, #tpu.memory_space<vmem>>, vector<1x64xf32>
    %16 = vector.broadcast %15 : vector<1x64xf32> to vector<128x64xf32>
    %17 = arith.addf %14, %16 : vector<128x64xf32>
    %cst_16 = arith.constant 0.000000e+00 : f32
    %18 = vector.broadcast %cst_16 : f32 to vector<128x64xf32>
    %19 = arith.maximumf %17, %18 : vector<128x64xf32>
    %c0_17 = arith.constant 0 : index
    %c0_18 = arith.constant 0 : index
    %20 = vector.load %arg8[%c0_17, %c0_18] : memref<1x64xbf16, #tpu.memory_space<vmem>>, vector<1x64xbf16>
    %21 = arith.truncf %19 : vector<128x64xf32> to vector<128x64xbf16>
    %cst_19 = arith.constant dense<0.000000e+00> : vector<1x128xf32>
    %22 = tpu.matmul %20, %21, %cst_19 {dimension_numbers = #tpu.dot_dimension_numbers<[1], [1], [0], [0], [0, 0, 1, 0], [], []>} : vector<1x64xbf16>, vector<128x64xbf16>, vector<1x128xf32> -> vector<1x128xf32>
    %c0_20 = arith.constant 0 : index
    %c0_21 = arith.constant 0 : index
    %23 = memref.load %arg9[%c0_20, %c0_21] : memref<1x1xf32, #tpu.memory_space<smem>>
    %24 = vector.broadcast %23 : f32 to vector<1x128xf32>
    %25 = arith.addf %22, %24 : vector<1x128xf32>
    %26 = arith.negf %25 : vector<1x128xf32>
    %27 = math.exp %26 : vector<1x128xf32>
    %cst_22 = arith.constant 1.000000e+00 : f32
    %28 = vector.broadcast %cst_22 : f32 to vector<1x128xf32>
    %29 = arith.addf %28, %27 : vector<1x128xf32>
    %30 = arith.divf %28, %29 : vector<1x128xf32>
    %31 = vector.shape_cast %30 : vector<1x128xf32> to vector<1x1x128xf32>
    %c0_23 = arith.constant 0 : index
    %c0_24 = arith.constant 0 : index
    %c0_25 = arith.constant 0 : index
    %32 = vector.load %arg10[%c0_23, %c0_24, %c0_25] : memref<1x1x128xf32, #tpu.memory_space<vmem>>, vector<1x1x128xf32>
    tpu.vector_store %arg10[%c0_23, %c0_24, %c0_25], %31 {strides = array<i32>} : memref<1x1x128xf32, #tpu.memory_space<vmem>>, vector<1x1x128xf32>,
    return
  }
  func.func @transform_0(%arg0: i32) -> (i32, i32) {
    %c0_i32 = arith.constant 0 : i32
    %c0_i32_0 = arith.constant 0 : i32
    return %arg0, %c0_i32 : i32, i32
  }
  func.func @transform_1(%arg0: i32) -> (i32, i32) {
    %c0_i32 = arith.constant 0 : i32
    %c0_i32_0 = arith.constant 0 : i32
    return %arg0, %c0_i32 : i32, i32
  }
  func.func @transform_2(%arg0: i32) -> (i32, i32) {
    %c0_i32 = arith.constant 0 : i32
    %c0_i32_0 = arith.constant 0 : i32
    %c0_i32_1 = arith.constant 0 : i32
    return %c0_i32, %c0_i32_0 : i32, i32
  }
  func.func @transform_3(%arg0: i32) -> (i32, i32) {
    %c0_i32 = arith.constant 0 : i32
    %c0_i32_0 = arith.constant 0 : i32
    %c0_i32_1 = arith.constant 0 : i32
    return %c0_i32, %c0_i32_0 : i32, i32
  }
  func.func @transform_4(%arg0: i32) -> (i32, i32) {
    %c0_i32 = arith.constant 0 : i32
    %c0_i32_0 = arith.constant 0 : i32
    %c0_i32_1 = arith.constant 0 : i32
    return %c0_i32, %c0_i32_0 : i32, i32
  }
  func.func @transform_5(%arg0: i32) -> (i32, i32) {
    %c0_i32 = arith.constant 0 : i32
    %c0_i32_0 = arith.constant 0 : i32
    %c0_i32_1 = arith.constant 0 : i32
    return %c0_i32, %c0_i32_0 : i32, i32
  }
  func.func @transform_6(%arg0: i32) -> (i32, i32) {
    %c0_i32 = arith.constant 0 : i32
    %c0_i32_0 = arith.constant 0 : i32
    %c0_i32_1 = arith.constant 0 : i32
    return %c0_i32, %c0_i32_0 : i32, i32
  }
  func.func @transform_7(%arg0: i32) -> (i32, i32) {
    %c0_i32 = arith.constant 0 : i32
    %c0_i32_0 = arith.constant 0 : i32
    %c0_i32_1 = arith.constant 0 : i32
    return %c0_i32, %c0_i32_0 : i32, i32
  }
  func.func @transform_8(%arg0: i32) -> (i32, i32) {
    %c0_i32 = arith.constant 0 : i32
    %c0_i32_0 = arith.constant 0 : i32
    %c0_i32_1 = arith.constant 0 : i32
    return %c0_i32, %c0_i32_0 : i32, i32
  }
  func.func @transform_9(%arg0: i32) -> (i32, i32, i32) {
    %c0_i32 = arith.constant 0 : i32
    %c0_i32_0 = arith.constant 0 : i32
    %c0_i32_1 = arith.constant 0 : i32
    return %arg0, %c0_i32, %c0_i32_0 : i32, i32, i32
  }
}

</mosaic_0001>

<bundles_post_ra>
// kernel: tpu_custom_call.1
= control target key start
LH: loop header
LB: loop body
LE: loop exit
PB: predicated region body
PF: predicated region fallthrough
CT: control target
= control target key end

     0   :  { %vm147_vm0 = vcmask 523264   ;;  %s1271_s0 = inlined_call_operand.vmem [shape: bf16[128,64], index: 0, kind: input, shape index: {}]   ;;  %s1272_s1 = inlined_call_operand.vmem [shape: bf16[128,64], index: 1, kind: input, shape index: {}]   ;;  %s1273_s2 = inlined_call_operand.vmem [shape: bf16[64,128], index: 2, kind: input, shape index: {}]   ;;  %s1274_s3 = inlined_call_operand.vmem [shape: bf16[64,128], index: 3, kind: input, shape index: {}]   ;;  %s1275_s4 = inlined_call_operand.vmem [shape: f32[1,128], index: 4, kind: input, shape index: {}]   ;;  %s1276_s5 = inlined_call_operand.vmem [shape: bf16[128,64], index: 5, kind: input, shape index: {}]   ;;  %s1277_s6 = inlined_call_operand.vmem [shape: f32[1,64], index: 6, kind: input, shape index: {}]   ;;  %s1278_s7 = inlined_call_operand.vmem [shape: bf16[1,64], index: 7, kind: input, shape index: {}]   ;;  %s1279_s8 = inlined_call_operand.<no memory space> [shape: f32[1,1], index: 8, kind: input, shape index: {}]   ;;  %s1280_s9 = inlined_call_operand.hbm [shape: f32[1,1,128], index: 9, kind: output, shape index: {}]  }
   0x1   :  { %v1004_v0 = vld [vmem:[%s1274_s3] sm:$0xff]   ;;  %v1005_v1 = vld [vmem:[%s1274_s3 + $0x8] sm:$0xff]   ;;  %v1006_v2 = vld [vmem:[%s1274_s3 + $0x10] sm:$0xff]  }
   0x2   :  { %885 = vmatprep.subr.bf16.mxu0 %v1004_v0  ;;  %v1008_v3 = vld [vmem:[%s1272_s1] sm:$0xff]   ;;  %v1007_v4 = vld [vmem:[%s1274_s3 + $0x18] sm:$0xff]   ;;  %v1009_v6 = vld [vmem:[%s1272_s1 + $0x8] sm:$0xff]  }
   0x3   :  { %886 = vmatpush3.bf16.msra.mxu0 %v1004_v0  ;;  %893 = vmatprep.mubr.msk.bf16.mxu0 %vm147_vm0, %v1008_v3  ;;  %v1010_v5 = vld [vmem:[%s1273_s2] sm:$0xff]   ;;  %v1011_v7 = vld [vmem:[%s1272_s1 + $0x10] sm:$0xff]   ;;  %v1013_v8 = vld [vmem:[%s1273_s2 + $0x8] sm:$0xff]  }
   0x4   :  { %887 = vmatprep.subr.bf16.mxu0 %v1005_v1  ;;  %v1016_v9 = vld [vmem:[%s1273_s2 + $0x10] sm:$0xff]   ;;  %v1012_v10 = vld [vmem:[%s1272_s1 + $0x18] sm:$0xff]   ;;  %v1014_v11 = vld [vmem:[%s1272_s1 + $0x20] sm:$0xff]  }
   0x5   :  { %v1019_v12 = vld [vmem:[%s1273_s2 + $0x18] sm:$0xff]   ;;  %v1028_v13 = vld [vmem:[%s1276_s5] sm:$0xff]   ;;  %v1029_v14 = vld [vmem:[%s1276_s5 + $0x8] sm:$0xff]  }
   0x6   :  { %933 = vmatprep.subr.bf16.mxu1 %v1028_v13  ;;  %v1015_v15 = vld [vmem:[%s1272_s1 + $0x28] sm:$0xff]   ;;  %v1030_v16 = vld [vmem:[%s1276_s5 + $0x10] sm:$0xff]  }
   0x7   :  { %888 = vmatpush3.bf16.msra.mxu0 %v1005_v1  ;;  %934 = vmatpush3.bf16.msra.mxu1 %v1028_v13  ;;  %v1017_v17 = vld [vmem:[%s1272_s1 + $0x30] sm:$0xff]  }
   0x8   :  { %889 = vmatprep.subr.bf16.mxu0 %v1006_v2  ;;  %935 = vmatprep.subr.bf16.mxu1 %v1029_v14 }
   0xb   :  { %890 = vmatpush3.bf16.msra.mxu0 %v1006_v2 }
   0xc   :  { %891 = vmatprep.subr.bf16.mxu0 %v1007_v4 }
   0xf   :  { %892 = vmatpush3.bf16.msra.mxu0 %v1007_v4 }
  0x10   :  { %909 = vmatprep.subr.bf16.mxu0 %v1010_v5 }
  0x12   :  { %894 = vmatmul.mubr.msk.bf16.vlgmr.msra.gmra.mrb[0].mxu0 %vm147_vm0, %v1009_v6 }
  0x13   :  { %910 = vmatpush3.bf16.msra.mxu0 %v1010_v5  ;;  %897 = vmatprep.mubr.msk.bf16.mxu0 %vm147_vm0, %v1011_v7 }
  0x14   :  { %911 = vmatprep.subr.bf16.mxu0 %v1013_v8 }
  0x17   :  { %912 = vmatpush3.bf16.msra.mxu0 %v1013_v8 }
  0x18   :  { %913 = vmatprep.subr.bf16.mxu0 %v1016_v9 }
  0x1a   :  { %898 = vmatmul.mubr.msk.bf16.gmra.mrb[4].mxu0 %vm147_vm0, %v1012_v10 }
  0x1b   :  { %901 = vmatprep.mubr.msk.bf16.mxu0 %vm147_vm0, %v1014_v11  ;;  %914 = vmatpush3.bf16.msra.mxu0 %v1016_v9 }
  0x1c   :  { %915 = vmatprep.subr.bf16.mxu0 %v1019_v12 }
  0x1f   :  { %916 = vmatpush3.bf16.msra.mxu0 %v1019_v12 }
  0x20   :  { %15 = vsyncpa [#allocation4], 0  ;;  %936 = vmatpush3.bf16.msra.mxu1 %v1029_v14  ;;  %v1031_v18 = vld [vmem:[%s1276_s5 + $0x18] sm:$0xff]   ;;  %v1032_v19 = vld [vmem:[%s1276_s5 + $0x20] sm:$0xff]   ;;  %vm1065_vm1 = vmmov 0   ;;  %s1066_s29 = smov [#allocation3]  }
  0x21   :  { %937 = vmatprep.subr.bf16.mxu1 %v1030_v16  ;;  %v1018_v20 = vld [vmem:[%s1272_s1 + $0x38] sm:$0xff]   ;;  %v1020_v21 = vld [vmem:[%s1271_s0] sm:$0xff]   ;;  %v1033_v22 = vld [vmem:[%s1276_s5 + $0x28] sm:$0xff]   ;;  %s776_s30 = sshll.u32 %s1066_s29, 4  ;;  %s777_s30 = int_to_ptr.vmem [resolvable:$true] %s776_s30 }
  0x22   :  { %902 = vmatmul.mubr.msk.bf16.gmra.mrb[8].mxu0 %vm147_vm0, %v1015_v15  ;;  %v1021_v23 = vld [vmem:[%s1271_s0 + $0x8] sm:$0xff]   ;;  %v1022_v24 = vld [vmem:[%s1271_s0 + $0x10] sm:$0xff]   ;;  %v1023_v25 = vld [vmem:[%s1271_s0 + $0x18] sm:$0xff]   ;;  %s1044_s10 = scalar_lea.vmem %s777_s30, 32  ;;  %p1045_p1 = scmp.lt.s32.totalorder %s777_s30, %s777_s30 }
  0x23   :  { %905 = vmatprep.mubr.msk.bf16.mxu0 %vm147_vm0, %v1017_v17  ;;  %v1024_v26 = vld [vmem:[%s1271_s0 + $0x20] sm:$0xff]   ;;  %v1025_v27 = vld [vmem:[%s1271_s0 + $0x28] sm:$0xff]   ;;  %v1026_v28 = vld [vmem:[%s1271_s0 + $0x30] sm:$0xff]  }
  0x24   :  { %938 = vmatpush3.bf16.msra.mxu1 %v1030_v16  ;;  %v1027_v29 = vld [vmem:[%s1271_s0 + $0x38] sm:$0xff]   ;;  %v1034_v30 = vld [vmem:[%s1276_s5 + $0x30] sm:$0xff]   ;;  %v824_v32 = vld [vmem:[%s1275_s4] ss:$0 sm:$0xff] }
  0x25   :  { %939 = vmatprep.subr.bf16.mxu1 %v1031_v18  ;;  %v1035_v31 = vld [vmem:[%s1276_s5 + $0x38] sm:$0xff]  }
  0x28   :  { %940 = vmatpush3.bf16.msra.mxu1 %v1031_v18 }
  0x29   :  { %941 = vmatprep.subr.bf16.mxu1 %v1032_v19 }
  0x2a   :  { %906 = vmatmul.mubr.msk.bf16.gmra.mrb[12].mxu0 %vm147_vm0, %v1018_v20 }
  0x2b   :  { %917 = vmatprep.mubr.msk.bf16.mxu0 %vm147_vm0, %v1020_v21 }
  0x2c   :  { %942 = vmatpush3.bf16.msra.mxu1 %v1032_v19 }
  0x2d   :  { %943 = vmatprep.subr.bf16.mxu1 %v1033_v22 }
  0x30   :  { %944 = vmatpush3.bf16.msra.mxu1 %v1033_v22 }
  0x31   :  { %945 = vmatprep.subr.bf16.mxu1 %v1034_v30 }
  0x32   :  { %918 = vmatmul.mubr.msk.bf16.vlgmr.msra.gmra.mrb[0].mxu0 %vm147_vm0, %v1021_v23 }
  0x33   :  { %921 = vmatprep.mubr.msk.bf16.mxu0 %vm147_vm0, %v1022_v24 }
  0x34   :  { %946 = vmatpush3.bf16.msra.mxu1 %v1034_v30 }
  0x35   :  { %947 = vmatprep.subr.bf16.mxu1 %v1035_v31 }
  0x38   :  { %948 = vmatpush3.bf16.msra.mxu1 %v1035_v31 }
  0x3a   :  { %922 = vmatmul.mubr.msk.bf16.gmra.mrb[4].mxu0 %vm147_vm0, %v1023_v25  ;;  %v1064_v25 = vmov 0.0  }
  0x3b   :  { %925 = vmatprep.mubr.msk.bf16.mxu0 %vm147_vm0, %v1024_v26  ;;  %965 = vmatprep.subr.bf16.mxu1 %v1064_v25  ;;  %v825_v26 = vld [vmem:[%s1277_s6] ss:$0 sm:$0xff] }
  0x42   :  { %926 = vmatmul.mubr.msk.bf16.gmra.mrb[8].mxu0 %vm147_vm0, %v1025_v27 }
  0x43   :  { %929 = vmatprep.mubr.msk.bf16.mxu0 %vm147_vm0, %v1026_v28 }
  0x4a   :  { %930 = vmatmul.mubr.msk.bf16.gmra.mrb[12].mxu0 %vm147_vm0, %v1027_v29 }
 0x105   :  { %v919_v33 = vpop.f32.mrb[0].mxu0 }
 0x106   :  { %v463_v34 = vadd.f32 %v919_v33, %v824_v32  ;;  %v391_v35 = vpop.f32.mrb[1].mxu0 }
 0x107   :  { %v461_v36 = vadd.f32 %v824_v32, %v391_v35  ;;  %v920_v37 = vpop.f32.mrb[2].mxu0 }
 0x108   :  { %v464_v38 = vadd.f32 %v920_v37, %v824_v32  ;;  %v394_v39 = vpop.f32.mrb[3].mxu0  ;;  %v479_v41 = vmax.f32 %v463_v34, 0.0 }
 0x109   :  { %v462_v40 = vadd.f32 %v824_v32, %v394_v39  ;;  %v477_v43 = vmax.f32 %v461_v36, 0.0 }
 0x10a   :  { %v480_v42 = vmax.f32 %v464_v38, 0.0 }
 0x10b   :  { %v478_v44 = vmax.f32 %v462_v40, 0.0 }
 0x10c   :  { %v494_v45 = vpack.c.bf16 %v480_v42, %v479_v41 }
 0x10d   :  { %v923_v46 = vpop.f32.mrb[4].mxu0  ;;  %v493_v47 = vpack.c.bf16 %v478_v44, %v477_v43 }
 0x10e   :  { %v467_v48 = vadd.f32 %v923_v46, %v824_v32  ;;  %v407_v49 = vpop.f32.mrb[5].mxu0 }
 0x10f   :  { %v465_v50 = vadd.f32 %v824_v32, %v407_v49  ;;  %v924_v51 = vpop.f32.mrb[6].mxu0  ;;  %949 = vmatprep.mubr.bf16.mxu1 %v493_v47 }
 0x110   :  { %v468_v52 = vadd.f32 %v924_v51, %v824_v32  ;;  %v410_v53 = vpop.f32.mrb[7].mxu0  ;;  %950 = vmatmul.mubr.bf16.vlgmr.msra.gmra.mrb[0].mxu1 %v494_v45  ;;  %v483_v55 = vmax.f32 %v467_v48, 0.0 }
 0x111   :  { %v466_v54 = vadd.f32 %v824_v32, %v410_v53  ;;  %v481_v57 = vmax.f32 %v465_v50, 0.0 }
 0x112   :  { %v484_v56 = vmax.f32 %v468_v52, 0.0 }
 0x113   :  { %v482_v58 = vmax.f32 %v466_v54, 0.0 }
 0x114   :  { %v496_v59 = vpack.c.bf16 %v484_v56, %v483_v55 }
 0x115   :  { %v495_v60 = vpack.c.bf16 %v482_v58, %v481_v57  ;;  %v927_v61 = vpop.f32.mrb[8].mxu0 }
 0x116   :  { %v471_v62 = vadd.f32 %v927_v61, %v824_v32  ;;  %v423_v63 = vpop.f32.mrb[9].mxu0 }
 0x117   :  { %v469_v0 = vadd.f32 %v824_v32, %v423_v63  ;;  %v928_v1 = vpop.f32.mrb[10].mxu0  ;;  %953 = vmatprep.mubr.bf16.mxu1 %v495_v60 }
 0x118   :  { %v472_v2 = vadd.f32 %v928_v1, %v824_v32  ;;  %v426_v3 = vpop.f32.mrb[11].mxu0  ;;  %954 = vmatmul.mubr.bf16.gmra.mrb[4].mxu1 %v496_v59  ;;  %v487_v5 = vmax.f32 %v471_v62, 0.0 }
 0x119   :  { %v470_v4 = vadd.f32 %v824_v32, %v426_v3  ;;  %v485_v7 = vmax.f32 %v469_v0, 0.0 }
 0x11a   :  { %v488_v6 = vmax.f32 %v472_v2, 0.0 }
 0x11b   :  { %v486_v8 = vmax.f32 %v470_v4, 0.0 }
 0x11c   :  { %v498_v9 = vpack.c.bf16 %v488_v6, %v487_v5 }
 0x11d   :  { %v497_v10 = vpack.c.bf16 %v486_v8, %v485_v7  ;;  %v931_v11 = vpop.f32.mrb[12].mxu0 }
 0x11e   :  { %v475_v12 = vadd.f32 %v931_v11, %v824_v32  ;;  %v439_v13 = vpop.f32.mrb[13].mxu0 }
 0x11f   :  { %v473_v14 = vadd.f32 %v824_v32, %v439_v13  ;;  %v932_v15 = vpop.f32.mrb[14].mxu0  ;;  %957 = vmatprep.mubr.bf16.mxu1 %v497_v10 }
 0x120   :  { %v476_v16 = vadd.f32 %v932_v15, %v824_v32  ;;  %v442_v17 = vpop.f32.mrb[15].mxu0  ;;  %958 = vmatmul.mubr.bf16.gmra.mrb[8].mxu1 %v498_v9  ;;  %v491_v19 = vmax.f32 %v475_v12, 0.0 }
 0x121   :  { %v474_v18 = vadd.f32 %v824_v32, %v442_v17  ;;  %v489_v21 = vmax.f32 %v473_v14, 0.0 }
 0x122   :  { %v492_v20 = vmax.f32 %v476_v16, 0.0 }
 0x123   :  { %v490_v22 = vmax.f32 %v474_v18, 0.0 }
 0x124   :  { %v500_v23 = vpack.c.bf16 %v492_v20, %v491_v19 }
 0x125   :  { %v499_v24 = vpack.c.bf16 %v490_v22, %v489_v21 }
 0x127   :  { %961 = vmatprep.mubr.bf16.mxu1 %v499_v24 }
 0x128   :  { %962 = vmatmul.mubr.bf16.gmra.mrb[12].mxu1 %v500_v23 }
 0x129   :  { %981 = vmatprep.mubr.msk.bf16.mxu1 %vm1065_vm1, %v1064_v25 }
 0x1e3   :  { %v951_v27 = vpop.f32.mrb[0].mxu1 }
 0x1e4   :  { %v615_v28 = vadd.f32 %v951_v27, %v825_v26  ;;  %v606_v29 = vpop.f32.mrb[1].mxu1 }
 0x1e5   :  { %v607_v30 = vadd.f32 %v825_v26, %v606_v29  ;;  %v952_v31 = vpop.f32.mrb[2].mxu1  ;;  %v695_v29 = vstv %s1279_s8 }
 0x1e6   :  { %v618_v32 = vadd.f32 %v952_v31, %v825_v26  ;;  %v609_v33 = vpop.f32.mrb[3].mxu1  ;;  %v671_v35 = vmax.f32 %v615_v28, 0.0  ;;  %v685_v28 = vld [vmem:[%s1278_s7] sm:$0x1]  ;;  %s1040_s7 = scalar_lea.vmem %s777_s30, 16 }
 0x1e7   :  { %v610_v34 = vadd.f32 %v825_v26, %v609_v33  ;;  %v669_v37 = vmax.f32 %v607_v30, 0.0  ;;  %p1041_p0 = scmp.ne.s32.totalorder %s777_s30, %s1040_s7  ;;  %p1046_p2 = scmp.lt.s32.totalorder %s1044_s10, %s1040_s7 }
 0x1e8   :  { %v672_v36 = vmax.f32 %v618_v32, 0.0 }
 0x1e9   :  { %v670_v38 = vmax.f32 %v610_v34, 0.0  ;;  %p1047_p3 = por %p1046_p2, %p1045_p1 }
 0x1ea   :  { %v687_v39 = vpack.c.bf16 %v672_v36, %v671_v35 }
 0x1eb   :  { %v686_v40 = vpack.c.bf16 %v670_v38, %v669_v37  ;;  %v955_v41 = vpop.f32.mrb[4].mxu1  ;;  %p1048_p4 = pnand %p1047_p3, %p1041_p0 }
 0x1ec   :  { %v631_v42 = vadd.f32 %v955_v41, %v825_v26  ;;  %v622_v43 = vpop.f32.mrb[5].mxu1  ;;  %v703_v61 = vsel %vm147_vm0, %v687_v39, 0 }
 0x1ed   :  { %v623_v44 = vadd.f32 %v825_v26, %v622_v43  ;;  %v956_v45 = vpop.f32.mrb[6].mxu1  ;;  %v700_v46 = vsel %vm147_vm0, %v686_v40, 0 }
 0x1ee   :  { %v634_v47 = vadd.f32 %v956_v45, %v825_v26  ;;  %v625_v48 = vpop.f32.mrb[7].mxu1  ;;  %966 = vmatpush3.bf16.xpose.msra.mxu1 %v700_v46  ;;  %v675_v50 = vmax.f32 %v631_v42, 0.0 }
 0x1ef   :  { %v626_v49 = vadd.f32 %v825_v26, %v625_v48  ;;  %967 = vmatprep.subr.bf16.mxu1 %v1064_v25  ;;  %v673_v52 = vmax.f32 %v623_v44, 0.0 }
 0x1f0   :  { %v676_v51 = vmax.f32 %v634_v47, 0.0 }
 0x1f1   :  { %v674_v53 = vmax.f32 %v626_v49, 0.0 }
 0x1f2   :  { %v689_v54 = vpack.c.bf16 %v676_v51, %v675_v50 }
 0x1f3   :  { %v688_v55 = vpack.c.bf16 %v674_v53, %v673_v52  ;;  %v959_v56 = vpop.f32.mrb[8].mxu1 }
 0x1f4   :  { %v647_v57 = vadd.f32 %v959_v56, %v825_v26  ;;  %v638_v58 = vpop.f32.mrb[9].mxu1  ;;  %v709_v22 = vsel %vm147_vm0, %v689_v54, 0 }
 0x1f5   :  { %v639_v59 = vadd.f32 %v825_v26, %v638_v58  ;;  %v960_v60 = vpop.f32.mrb[10].mxu1  ;;  %v706_v12 = vsel %vm147_vm0, %v688_v55, 0 }
 0x1f6   :  { %v650_v62 = vadd.f32 %v960_v60, %v825_v26  ;;  %v641_v63 = vpop.f32.mrb[11].mxu1  ;;  %968 = vmatpush3.bf16.xpose.msra.mxu1 %v703_v61  ;;  %v679_v1 = vmax.f32 %v647_v57, 0.0 }
 0x1f7   :  { %v642_v0 = vadd.f32 %v825_v26, %v641_v63  ;;  %969 = vmatprep.subr.bf16.mxu1 %v1064_v25  ;;  %v677_v3 = vmax.f32 %v639_v59, 0.0 }
 0x1f8   :  { %v680_v2 = vmax.f32 %v650_v62, 0.0 }
 0x1f9   :  { %v678_v4 = vmax.f32 %v642_v0, 0.0 }
 0x1fa   :  { %v691_v5 = vpack.c.bf16 %v680_v2, %v679_v1 }
 0x1fb   :  { %v690_v6 = vpack.c.bf16 %v678_v4, %v677_v3  ;;  %v963_v7 = vpop.f32.mrb[12].mxu1 }
 0x1fc   :  { %v663_v8 = vadd.f32 %v963_v7, %v825_v26  ;;  %v654_v9 = vpop.f32.mrb[13].mxu1  ;;  %v715_v24 = vsel %vm147_vm0, %v691_v5, 0 }
 0x1fd   :  { %v655_v10 = vadd.f32 %v825_v26, %v654_v9  ;;  %v964_v11 = vpop.f32.mrb[14].mxu1  ;;  %v712_v23 = vsel %vm147_vm0, %v690_v6, 0 }
 0x1fe   :  { %v666_v13 = vadd.f32 %v964_v11, %v825_v26  ;;  %v657_v14 = vpop.f32.mrb[15].mxu1  ;;  %970 = vmatpush3.bf16.xpose.msra.mxu1 %v706_v12  ;;  %v683_v16 = vmax.f32 %v663_v8, 0.0 }
 0x1ff   :  { %v658_v15 = vadd.f32 %v825_v26, %v657_v14  ;;  %971 = vmatprep.subr.bf16.mxu1 %v1064_v25  ;;  %v681_v18 = vmax.f32 %v655_v10, 0.0 }
 0x200   :  { %v684_v17 = vmax.f32 %v666_v13, 0.0 }
 0x201   :  { %v682_v19 = vmax.f32 %v658_v15, 0.0 }
 0x202   :  { %v693_v20 = vpack.c.bf16 %v684_v17, %v683_v16 }
 0x203   :  { %v692_v21 = vpack.c.bf16 %v682_v19, %v681_v18 }
 0x204   :  { %v721_v27 = vsel %vm147_vm0, %v693_v20, 0 }
 0x205   :  { %v718_v26 = vsel %vm147_vm0, %v692_v21, 0 }
 0x206   :  { %972 = vmatpush3.bf16.xpose.msra.mxu1 %v709_v22 }
 0x207   :  { %973 = vmatprep.subr.bf16.mxu1 %v1064_v25 }
 0x20e   :  { %974 = vmatpush3.bf16.xpose.msra.mxu1 %v712_v23 }
 0x20f   :  { %975 = vmatprep.subr.bf16.mxu1 %v1064_v25 }
 0x216   :  { %976 = vmatpush3.bf16.xpose.msra.mxu1 %v715_v24 }
 0x217   :  { %977 = vmatprep.subr.bf16.mxu1 %v1064_v25 }
 0x21e   :  { %978 = vmatpush3.bf16.xpose.msra.mxu1 %v718_v26 }
 0x21f   :  { %979 = vmatprep.subr.bf16.mxu1 %v1064_v25 }
 0x226   :  { %980 = vmatpush3.bf16.xpose.msra.mxu1 %v721_v27 }
 0x22d   :  { %982 = vmatmul.mubr.msk.bf16.vlgmr.msra.gmra.mrb[16].mxu1 %vm147_vm0, %v685_v28 }
 0x300   :  { %v757_v30 = vpop.f32.mrb[16].mxu1 }
 0x301   :  { %v758_v31 = vadd.f32 %v757_v30, %v695_v29  ;;  %v983_v32 = vpop.f32.mrb[17].mxu1 }
 0x302   :  { %v760_v33 = vpop.f32.mrb[18].mxu1 }
 0x303   :  { %v835_v34 = vmul.f32 -1.442695, %v758_v31  ;;  %v984_v35 = vpop.f32.mrb[19].mxu1 }
 0x305   :  { %1036 = vpow2.f32 %v835_v34 }
 0x30f   :  { %v1037_v25 = vpop.eup %1036 }
 0x310   :  { %v766_v36 = vadd.f32 1.0, %v1037_v25 }
 0x312   :  { %1038 = vrcp.f32 %v766_v36 }
 0x31c   :  { %v1039_v37 = vpop.eup %1038 }
 0x31d   :  { %769 = vst [vmem:[#allocation3] sm:$0x1] %v1039_v37 }
 0x31e   :  { %1051 = shalt.err (!%p1048_p4)
}
 0x31f   :  { %s1052_s1 = scalar_lea.hbm %s1280_s9, 16 }
 0x320   :  { %p1053_p5 = scmp.ne.s32.totalorder %s1280_s9, %s1052_s1  ;;  %p1056_p6 = scmp.lt.u32.totalorder %s1052_s1, %s1280_s9 }
 0x322   :  { %p1058_p7 = pnand %p1056_p6, %p1053_p5 }
 0x324   :  { %1061 = shalt.err (!%p1058_p7)
}
 0x325   :  { %779 = dma.vmem_to_hbm [thread:$0]  %s777_s30, 16, %s1280_s9, [#allocation4]  }
 0x326   :  { %1062 = dma.done.wait [#allocation4], 16  }
 0x327   :  { %1063 = vsyncadd [#allocation4], 4294967280 }
 0x328   :  { %783 = vsyncpa [#allocation4], 1 }

</bundles_post_ra>
